<compile_context>
chip_gen: v7x
topology: tpu7x:2x2x1
jax: 0.10.0
libtpu: 0.0.40
codegen_flags: <defaults>
</compile_context>

<pallas_src>
import functools

import jax
import jax.numpy as jnp
from jax.experimental import pallas as pl
from jax.experimental.pallas import tpu as pltpu

F32 = jnp.float32
LN_EPS = 1e-5          # nn.LayerNorm default eps
IN_SIZE = 16           # feature_num * feature_size (autoencoder input)
D_MODEL = 8            # auto_hidden == feature_size // 2
FF_DIM = 32            # dim_feedforward


# ---------------------------------------------------------------------------
# kernel helpers
# ---------------------------------------------------------------------------
def _i32(v):
    """Python int -> wrapped int32 constant (for >2^31 hash constants)."""
    return jnp.int32(((v + 0x80000000) & 0xFFFFFFFF) - 0x80000000)


def _hash_noise(shape, seed, offset):
    """~N(0,1) noise from a stateless integer hash (pure jnp ops, runs on every
    TPU generation and in interpret mode).

    One 32-bit hash per element, split into two 16-bit uniforms -> triangular
    distribution rescaled to unit variance.  For 0.01-scale corruption noise the
    distribution fidelity vs torch.randn is irrelevant.
    """
    # TODO(synk): swap for an exact Gaussian (Box-Muller) if bit-faithful randn
    # tails ever matter.
    r = jax.lax.broadcasted_iota(jnp.int32, shape, 0)
    c = jax.lax.broadcasted_iota(jnp.int32, shape, 1)
    h = r * jnp.int32(shape[1]) + c + offset
    h = h + seed * _i32(0x9E3779B9)
    # xorshift-multiply mixing (wrapping int32 arithmetic)
    h = (h ^ (h >> 15)) * _i32(0x85EBCA6B)
    h = (h ^ (h >> 13)) * _i32(0xC2B2AE35)
    h = h ^ (h >> 16)
    lo = (h & 0xFFFF).astype(F32)                  # [0, 65535]
    hi = ((h >> 16) & 0xFFFF).astype(F32)          # [0, 65535]
    tri = (lo + hi) * (1.0 / 65536.0) - (65535.0 / 65536.0)   # mean 0, var 1/6
    return tri * 2.449489742783178                 # sqrt(6) -> unit variance


def _layer_norm_cols(v, w, b):
    """LayerNorm over the feature axis (axis 0; batch is on lanes)."""
    mu = jnp.mean(v, axis=0, keepdims=True)
    var = jnp.mean((v - mu) ** 2, axis=0, keepdims=True)
    return (v - mu) * jax.lax.rsqrt(var + LN_EPS) * w + b


# ---------------------------------------------------------------------------
# the kernel
# ---------------------------------------------------------------------------
def _net_kernel(seed_ref, x_ref, w_ref, b_ref, out_ref, dec_ref, *, noise_level):
    x = x_ref[...]                                            # (16, TB) batch on lanes

    if noise_level != 0.0:                                    # static guard: noiseless
        tb = x.shape[1]                                       # path emits no noise code
        offset = pl.program_id(0) * jnp.int32(IN_SIZE * tb)   # unique counter per tile
        x = x + noise_level * _hash_noise(x.shape, seed_ref[0], offset)

    # ---- packed parameters (PyTorch (out,in) layout -> W @ X, no transposes) ----
    ae_w1 = w_ref[0:8, 0:16]        # fc1: 16 -> 8
    w_stack = w_ref[8:32, 0:8]      # rows 0:16 = fc2 (decoder), rows 16:24 = fused attn
    ff_w1 = w_ref[32:64, 0:8]       # linear1: 8 -> 32
    ff_w2 = w_ref[64:72, 0:32]      # linear2: 32 -> 8
    head_w = w_ref[72:73, 0:8]      # final linear: 8 -> 1

    ae_b1 = b_ref[0:8, 0:1]
    b_stack = b_ref[0:24, 1:2]      # rows 0:16 = fc2 bias, rows 16:24 = pe0+wvo@pe0+bvo
    ln1_w = b_ref[0:8, 2:3]
    ln1_b = b_ref[0:8, 3:4]
    ff_b1 = b_ref[0:32, 4:5]
    ff_b2 = b_ref[0:8, 5:6]
    ln2_w = b_ref[0:8, 6:7]
    ln2_b = b_ref[0:8, 7:8]
    head_b = b_ref[0:1, 8:9]

    # ---- Autoencoder encoder ----
    enc = jnp.maximum(
        jnp.dot(ae_w1, x, preferred_element_type=F32) + ae_b1, 0.0)         # (8, TB)

    # ---- decoder + (positional encoding + attention) fused into ONE matmul ----
    # seq_len == 1 -> softmax over the single key == 1 -> attn == out_proj(value_proj(src));
    # src = enc + pe0, and pe0 terms are folded into the bias column on the host.
    y = jnp.dot(w_stack, enc, preferred_element_type=F32) + b_stack          # (24, TB)
    dec_ref[...] = y[0:16, :]                                                # decode

    # ---- TransformerEncoderLayer (post-norm, relu, dropout=0) ----
    h = _layer_norm_cols(enc + y[16:24, :], ln1_w, ln1_b)                    # (8, TB)

    ffh = jnp.maximum(
        jnp.dot(ff_w1, h, preferred_element_type=F32) + ff_b1, 0.0)          # (32, TB)
    ff = jnp.dot(ff_w2, ffh, preferred_element_type=F32) + ff_b2             # (8, TB)
    h2 = _layer_norm_cols(h + ff, ln2_w, ln2_b)

    # ---- Final linear head (8 -> 1) ----
    out_ref[...] = jnp.dot(head_w, h2, preferred_element_type=F32) + head_b  # (1, TB)


# ---------------------------------------------------------------------------
# host-side parameter construction / packing
# ---------------------------------------------------------------------------
def make_params(key, feature_size=16, hidden_dim=32):
    """Deterministic synthetic parameters in PyTorch Linear layout (out, in)."""
    d = feature_size // 2  # auto_hidden == d_model == 8

    def lin(k, out_f, in_f):
        k1, k2 = jax.random.split(k)
        bound = 1.0 / jnp.sqrt(jnp.float32(in_f))
        w = jax.random.uniform(k1, (out_f, in_f), F32, -bound, bound)
        b = jax.random.uniform(k2, (out_f,), F32, -bound, bound)
        return w, b

    ks = jax.random.split(key, 7)
    ae_w1, ae_b1 = lin(ks[0], d, feature_size)           # fc1: 16 -> 8
    ae_w2, ae_b2 = lin(ks[1], feature_size, d)           # fc2: 8 -> 16
    in_w, in_b = lin(ks[2], 3 * d, d)                    # MHA in_proj (only V matters)
    wv, bv = in_w[2 * d:, :], in_b[2 * d:]
    wo, bo = lin(ks[3], d, d)                            # MHA out_proj
    ff_w1, ff_b1 = lin(ks[4], hidden_dim, d)             # linear1: 8 -> 32
    ff_w2, ff_b2 = lin(ks[5], d, hidden_dim)             # linear2: 32 -> 8
    head_w, head_b = lin(ks[6], 1, d)                    # linear: 8 -> 1

    # Positional encoding table; forward only uses row 0 (seq_len == 1).
    pos = jnp.arange(d, dtype=F32).reshape(-1, 1)
    div = jnp.power(10000.0, jnp.arange(0, d, 2, dtype=F32) / d)
    X = pos / div
    P = jnp.zeros((d, d), F32)
    P = P.at[:, 0::2].set(jnp.sin(X))
    P = P.at[:, 1::2].set(jnp.cos(X))
    pe = P[0]                                            # (8,) -> [0,1,0,1,...]

    return dict(ae_w1=ae_w1, ae_b1=ae_b1, ae_w2=ae_w2, ae_b2=ae_b2, pe=pe,
                wv=wv, bv=bv, wo=wo, bo=bo,
                ln1_w=jnp.ones((d,), F32), ln1_b=jnp.zeros((d,), F32),
                ff_w1=ff_w1, ff_b1=ff_b1, ff_w2=ff_w2, ff_b2=ff_b2,
                ln2_w=jnp.ones((d,), F32), ln2_b=jnp.zeros((d,), F32),
                head_w=head_w, head_b=head_b)


def pack_params(p):
    """Fuse value_proj+out_proj (+PE) and pack all params into two small slabs.

    The fusions are exact only because seq_len == 1, dropout == 0, num_layers == 1.
    """
    assert p["ae_w1"].shape == (D_MODEL, IN_SIZE)
    assert p["wo"].shape == (D_MODEL, D_MODEL) and p["wv"].shape == (D_MODEL, D_MODEL)
    assert p["ff_w1"].shape == (FF_DIM, D_MODEL) and p["ff_w2"].shape == (D_MODEL, FF_DIM)

    wvo = p["wo"] @ p["wv"]                      # (8,8)  exact for seq_len == 1
    bvo = p["bo"] + p["wo"] @ p["bv"]            # (8,)
    # residual+attention bias: src + attn = enc + wvo@enc + (pe0 + wvo@pe0 + bvo)
    c1 = p["pe"] + wvo @ p["pe"] + bvo           # (8,)

    w = jnp.zeros((80, 32), F32)
    w = w.at[0:8, 0:16].set(p["ae_w1"])
    w = w.at[8:24, 0:8].set(p["ae_w2"])          # decoder rows of the stacked matmul
    w = w.at[24:32, 0:8].set(wvo)                # fused attention rows
    w = w.at[32:64, 0:8].set(p["ff_w1"])
    w = w.at[64:72, 0:32].set(p["ff_w2"])
    w = w.at[72:73, 0:8].set(p["head_w"])

    b = jnp.zeros((32, 16), F32)                 # biases stored as columns
    b = b.at[0:8, 0].set(p["ae_b1"])
    b = b.at[0:16, 1].set(p["ae_b2"])            # stacked bias: decoder part
    b = b.at[16:24, 1].set(c1)                   # stacked bias: attention+PE part
    b = b.at[0:8, 2].set(p["ln1_w"])
    b = b.at[0:8, 3].set(p["ln1_b"])
    b = b.at[0:32, 4].set(p["ff_b1"])
    b = b.at[0:8, 5].set(p["ff_b2"])
    b = b.at[0:8, 6].set(p["ln2_w"])
    b = b.at[0:8, 7].set(p["ln2_b"])
    b = b.at[0, 8].set(p["head_b"][0])
    return w, b


# ---------------------------------------------------------------------------
# wrapper
# ---------------------------------------------------------------------------
def _round_up(n, m):
    return ((n + m - 1) // m) * m


def net_forward(x, w_slab, b_slab, seed, noise_level=0.01, tile_b=None):
    """x: (batch, feature_num, feature_size) with feature_num*feature_size == 16."""
    batch = x.shape[0]
    x_flat = x.reshape(batch, -1).astype(F32)               # torch .reshape(batch, -1)
    assert x_flat.shape[1] == IN_SIZE, "feature_num * feature_size must equal 16"

    # batch-on-lanes layout; tile so the grid has >= 2 (and an even number of)
    # steps -> BlockSpec double-buffering overlaps DMA with compute and the
    # "parallel" axis shards across v7x's two TensorCores.  tile_b <= 8192 keeps
    # per-tile intermediates well inside every generation's scoped VMEM default.
    if tile_b is None:
        tile_b = min(8192, max(128, _round_up(pl.cdiv(batch, 4), 128)))
    grid_n = max(2, pl.cdiv(batch, tile_b))
    if grid_n % 2:
        grid_n += 1
    bp = grid_n * tile_b

    # NOTE(perf): this pad/transpose and the output .T below each cost an extra
    # HBM pass; keep the (16,B)/(1,B) lane-dense layout through the surrounding
    # graph if this kernel is embedded in a larger pipeline.
    x_t = jnp.zeros((IN_SIZE, bp), F32).at[:, :batch].set(x_flat.T)

    kernel = functools.partial(_net_kernel, noise_level=float(noise_level))

    out_t, dec_t = pl.pallas_call(
        kernel,
        out_shape=(
            jax.ShapeDtypeStruct((1, bp), F32),
            jax.ShapeDtypeStruct((IN_SIZE, bp), F32),
        ),
        grid=(grid_n,),
        in_specs=[
            pl.BlockSpec(memory_space=pltpu.MemorySpace.SMEM),      # PRNG seed scalar
            pl.BlockSpec((IN_SIZE, tile_b), lambda i: (0, i)),      # x, batch-tiled
            pl.BlockSpec(w_slab.shape, lambda i: (0, 0)),           # weights (resident)
            pl.BlockSpec(b_slab.shape, lambda i: (0, 0)),           # biases  (resident)
        ],
        out_specs=(
            pl.BlockSpec((1, tile_b), lambda i: (0, i)),            # out (lane-dense)
            pl.BlockSpec((IN_SIZE, tile_b), lambda i: (0, i)),      # decode
        ),
        compiler_params=pltpu.CompilerParams(
            dimension_semantics=("parallel",)),
    )(seed, x_t, w_slab, b_slab)

    out = out_t[:, :batch].T        # (batch, 1)   — PyTorch convention
    decode = dec_t[:, :batch].T     # (batch, 16)
    return out, decode


# pure-JAX reference of Net.forward with noise disabled (validation only)
def net_reference_noiseless(x, p):
    xf = x.reshape(x.shape[0], -1).astype(F32)

    def lnf(v, w, b):
        mu = v.mean(-1, keepdims=True)
        var = ((v - mu) ** 2).mean(-1, keepdims=True)
        return (v - mu) / jnp.sqrt(var + LN_EPS) * w + b

    enc = jax.nn.relu(xf @ p["ae_w1"].T + p["ae_b1"])
    dec = enc @ p["ae_w2"].T + p["ae_b2"]
    src = enc + p["pe"]
    v = src @ p["wv"].T + p["bv"]
    attn = v @ p["wo"].T + p["bo"]           # softmax over a single key == 1
    h = lnf(src + attn, p["ln1_w"], p["ln1_b"])
    ffh = jax.nn.relu(h @ p["ff_w1"].T + p["ff_b1"])
    ff = ffh @ p["ff_w2"].T + p["ff_b2"]
    h2 = lnf(h + ff, p["ln2_w"], p["ln2_b"])
    out = h2 @ p["head_w"].T + p["head_b"]
    return out, dec


if __name__ == "__main__":
    key = jax.random.PRNGKey(0)
    k_param, k_x = jax.random.split(key)

    # x: (batch=2, feature_num=1, feature_size=16) — the module's reshapes require
    # feature_num * feature_size == 16 and imply transformer seq_len == 1.
    x = jax.random.normal(k_x, (2, 1, 16), F32)
    params = make_params(k_param, feature_size=16, hidden_dim=32)
    w_slab, b_slab = pack_params(params)
    seed = jnp.array([1234], jnp.int32)

    # deterministic correctness check (noise path statically disabled)
    out0, dec0 = net_forward(x, w_slab, b_slab, seed, noise_level=0.0)
    out0, dec0 = jax.block_until_ready((out0, dec0))
    ref_out, ref_dec = net_reference_noiseless(x, params)
    assert jnp.allclose(out0, ref_out, atol=1e-3, rtol=1e-3)
    assert jnp.allclose(dec0, ref_dec, atol=1e-3, rtol=1e-3)

    # real forward with in-kernel denoising-autoencoder noise
    out, decode = net_forward(x, w_slab, b_slab, seed, noise_level=0.01)
    out, decode = jax.block_until_ready((out, decode))

    assert out.shape == (2, 1) and decode.shape == (2, 16)
    assert bool(jnp.all(jnp.isfinite(out))) and bool(jnp.all(jnp.isfinite(decode)))
    print("KERNEL_OK")
</pallas_src>

<mosaic_0001>
module attributes {stable_mosaic.version = 11 : i64} {
  func.func @_net_kernel(%arg0: i32, %arg1: memref<1xi32, #tpu.memory_space<smem>>, %arg2: memref<16x128xf32, #tpu.memory_space<vmem>>, %arg3: memref<80x32xf32, #tpu.memory_space<vmem>>, %arg4: memref<32x16xf32, #tpu.memory_space<vmem>>, %arg5: memref<1x128xf32, #tpu.memory_space<vmem>>, %arg6: memref<16x128xf32, #tpu.memory_space<vmem>>) attributes {dimension_semantics = [#tpu.dimension_semantics<parallel>], iteration_bounds = array<i64: 2>, scalar_prefetch = 0 : i64, scratch_operands = 0 : i64, tpu.core_type = #tpu.core_type<tc>, window_params = [{transform_indices = @transform_0, window_bounds = array<i64: 1>}, {transform_indices = @transform_1, window_bounds = array<i64: 16, 128>}, {pipeline_mode = #tpu.pipeline_mode<synchronous>, transform_indices = @transform_2, window_bounds = array<i64: 80, 32>}, {pipeline_mode = #tpu.pipeline_mode<synchronous>, transform_indices = @transform_3, window_bounds = array<i64: 32, 16>}, {transform_indices = @transform_4, window_bounds = array<i64: 1, 128>}, {transform_indices = @transform_5, window_bounds = array<i64: 16, 128>}]} {
    %c0 = arith.constant 0 : index
    %c0_0 = arith.constant 0 : index
    %0 = vector.load %arg2[%c0, %c0_0] : memref<16x128xf32, #tpu.memory_space<vmem>>, vector<16x128xf32>
    %c0_1 = arith.constant 0 : index
    %c0_2 = arith.constant 0 : index
    %1 = vector.load %arg3[%c0_1, %c0_2] : memref<80x32xf32, #tpu.memory_space<vmem>>, vector<8x16xf32>
    %c8 = arith.constant 8 : index
    %c0_3 = arith.constant 0 : index
    %2 = vector.load %arg3[%c8, %c0_3] : memref<80x32xf32, #tpu.memory_space<vmem>>, vector<24x8xf32>
    %c32 = arith.constant 32 : index
    %c0_4 = arith.constant 0 : index
    %3 = vector.load %arg3[%c32, %c0_4] : memref<80x32xf32, #tpu.memory_space<vmem>>, vector<32x8xf32>
    %c64 = arith.constant 64 : index
    %c0_5 = arith.constant 0 : index
    %4 = vector.load %arg3[%c64, %c0_5] : memref<80x32xf32, #tpu.memory_space<vmem>>, vector<8x32xf32>
    %c72 = arith.constant 72 : index
    %c0_6 = arith.constant 0 : index
    %5 = vector.load %arg3[%c72, %c0_6] : memref<80x32xf32, #tpu.memory_space<vmem>>, vector<1x8xf32>
    %c0_7 = arith.constant 0 : index
    %c0_8 = arith.constant 0 : index
    %6 = vector.load %arg4[%c0_7, %c0_8] : memref<32x16xf32, #tpu.memory_space<vmem>>, vector<8x1xf32>
    %c0_9 = arith.constant 0 : index
    %c1 = arith.constant 1 : index
    %7 = vector.load %arg4[%c0_9, %c1] : memref<32x16xf32, #tpu.memory_space<vmem>>, vector<24x1xf32>
    %c0_10 = arith.constant 0 : index
    %c2 = arith.constant 2 : index
    %8 = vector.load %arg4[%c0_10, %c2] : memref<32x16xf32, #tpu.memory_space<vmem>>, vector<8x1xf32>
    %c0_11 = arith.constant 0 : index
    %c3 = arith.constant 3 : index
    %9 = vector.load %arg4[%c0_11, %c3] : memref<32x16xf32, #tpu.memory_space<vmem>>, vector<8x1xf32>
    %c0_12 = arith.constant 0 : index
    %c4 = arith.constant 4 : index
    %10 = vector.load %arg4[%c0_12, %c4] : memref<32x16xf32, #tpu.memory_space<vmem>>, vector<32x1xf32>
    %c0_13 = arith.constant 0 : index
    %c5 = arith.constant 5 : index
    %11 = vector.load %arg4[%c0_13, %c5] : memref<32x16xf32, #tpu.memory_space<vmem>>, vector<8x1xf32>
    %c0_14 = arith.constant 0 : index
    %c6 = arith.constant 6 : index
    %12 = vector.load %arg4[%c0_14, %c6] : memref<32x16xf32, #tpu.memory_space<vmem>>, vector<8x1xf32>
    %c0_15 = arith.constant 0 : index
    %c7 = arith.constant 7 : index
    %13 = vector.load %arg4[%c0_15, %c7] : memref<32x16xf32, #tpu.memory_space<vmem>>, vector<8x1xf32>
    %c0_16 = arith.constant 0 : index
    %c8_17 = arith.constant 8 : index
    %14 = vector.load %arg4[%c0_16, %c8_17] : memref<32x16xf32, #tpu.memory_space<vmem>>, vector<1x1xf32>
    %cst = arith.constant dense<0.000000e+00> : vector<8x128xf32>
    %15 = tpu.matmul %1, %0, %cst {dimension_numbers = #tpu.dot_dimension_numbers<[1], [0], [0], [1], [0, 0, 1, 1], [], []>} : vector<8x16xf32>, vector<16x128xf32>, vector<8x128xf32> -> vector<8x128xf32>
    %16 = vector.broadcast %6 : vector<8x1xf32> to vector<8x128xf32>
    %17 = arith.addf %15, %16 : vector<8x128xf32>
    %cst_18 = arith.constant 0.000000e+00 : f32
    %18 = vector.broadcast %cst_18 : f32 to vector<8x128xf32>
    %19 = arith.maximumf %17, %18 : vector<8x128xf32>
    %cst_19 = arith.constant dense<0.000000e+00> : vector<24x128xf32>
    %20 = tpu.matmul %2, %19, %cst_19 {dimension_numbers = #tpu.dot_dimension_numbers<[1], [0], [0], [1], [0, 0, 1, 1], [], []>} : vector<24x8xf32>, vector<8x128xf32>, vector<24x128xf32> -> vector<24x128xf32>
    %21 = vector.broadcast %7 : vector<24x1xf32> to vector<24x128xf32>
    %22 = arith.addf %20, %21 : vector<24x128xf32>
    %23 = vector.extract_strided_slice %22 {offsets = [0, 0], sizes = [16, 128], strides = [1, 1]} : vector<24x128xf32> to vector<16x128xf32>
    %c0_20 = arith.constant 0 : index
    %c0_21 = arith.constant 0 : index
    %24 = vector.load %arg6[%c0_20, %c0_21] : memref<16x128xf32, #tpu.memory_space<vmem>>, vector<16x128xf32>
    tpu.vector_store %arg6[%c0_20, %c0_21], %23 {strides = array<i32>} : memref<16x128xf32, #tpu.memory_space<vmem>>, vector<16x128xf32>,
    %25 = vector.extract_strided_slice %22 {offsets = [16, 0], sizes = [8, 128], strides = [1, 1]} : vector<24x128xf32> to vector<8x128xf32>
    %26 = arith.addf %19, %25 : vector<8x128xf32>
    %cst_22 = arith.constant dense<0.000000e+00> : vector<128xf32>
    %27 = vector.multi_reduction <add>, %26, %cst_22 [0] : vector<8x128xf32> to vector<128xf32>
    %28 = vector.shape_cast %27 : vector<128xf32> to vector<1x128xf32>
    %cst_23 = arith.constant 8.000000e+00 : f32
    %29 = vector.broadcast %cst_23 : f32 to vector<1x128xf32>
    %30 = arith.divf %28, %29 : vector<1x128xf32>
    %31 = vector.broadcast %30 : vector<1x128xf32> to vector<8x128xf32>
    %32 = arith.subf %26, %31 : vector<8x128xf32>
    %33 = arith.mulf %32, %32 : vector<8x128xf32>
    %cst_24 = arith.constant dense<0.000000e+00> : vector<128xf32>
    %34 = vector.multi_reduction <add>, %33, %cst_24 [0] : vector<8x128xf32> to vector<128xf32>
    %35 = vector.shape_cast %34 : vector<128xf32> to vector<1x128xf32>
    %cst_25 = arith.constant 8.000000e+00 : f32
    %36 = vector.broadcast %cst_25 : f32 to vector<1x128xf32>
    %37 = arith.divf %35, %36 : vector<1x128xf32>
    %38 = vector.broadcast %30 : vector<1x128xf32> to vector<8x128xf32>
    %39 = arith.subf %26, %38 : vector<8x128xf32>
    %cst_26 = arith.constant 9.99999974E-6 : f32
    %40 = vector.broadcast %cst_26 : f32 to vector<1x128xf32>
    %41 = arith.addf %37, %40 : vector<1x128xf32>
    %42 = math.rsqrt %41 : vector<1x128xf32>
    %43 = vector.broadcast %42 : vector<1x128xf32> to vector<8x128xf32>
    %44 = arith.mulf %39, %43 : vector<8x128xf32>
    %45 = vector.broadcast %8 : vector<8x1xf32> to vector<8x128xf32>
    %46 = arith.mulf %44, %45 : vector<8x128xf32>
    %47 = vector.broadcast %9 : vector<8x1xf32> to vector<8x128xf32>
    %48 = arith.addf %46, %47 : vector<8x128xf32>
    %cst_27 = arith.constant dense<0.000000e+00> : vector<32x128xf32>
    %49 = tpu.matmul %3, %48, %cst_27 {dimension_numbers = #tpu.dot_dimension_numbers<[1], [0], [0], [1], [0, 0, 1, 1], [], []>} : vector<32x8xf32>, vector<8x128xf32>, vector<32x128xf32> -> vector<32x128xf32>
    %50 = vector.broadcast %10 : vector<32x1xf32> to vector<32x128xf32>
    %51 = arith.addf %49, %50 : vector<32x128xf32>
    %cst_28 = arith.constant 0.000000e+00 : f32
    %52 = vector.broadcast %cst_28 : f32 to vector<32x128xf32>
    %53 = arith.maximumf %51, %52 : vector<32x128xf32>
    %cst_29 = arith.constant dense<0.000000e+00> : vector<8x128xf32>
    %54 = tpu.matmul %4, %53, %cst_29 {dimension_numbers = #tpu.dot_dimension_numbers<[1], [0], [0], [1], [0, 0, 1, 1], [], []>} : vector<8x32xf32>, vector<32x128xf32>, vector<8x128xf32> -> vector<8x128xf32>
    %55 = vector.broadcast %11 : vector<8x1xf32> to vector<8x128xf32>
    %56 = arith.addf %54, %55 : vector<8x128xf32>
    %57 = arith.addf %48, %56 : vector<8x128xf32>
    %cst_30 = arith.constant dense<0.000000e+00> : vector<128xf32>
    %58 = vector.multi_reduction <add>, %57, %cst_30 [0] : vector<8x128xf32> to vector<128xf32>
    %59 = vector.shape_cast %58 : vector<128xf32> to vector<1x128xf32>
    %cst_31 = arith.constant 8.000000e+00 : f32
    %60 = vector.broadcast %cst_31 : f32 to vector<1x128xf32>
    %61 = arith.divf %59, %60 : vector<1x128xf32>
    %62 = vector.broadcast %61 : vector<1x128xf32> to vector<8x128xf32>
    %63 = arith.subf %57, %62 : vector<8x128xf32>
    %64 = arith.mulf %63, %63 : vector<8x128xf32>
    %cst_32 = arith.constant dense<0.000000e+00> : vector<128xf32>
    %65 = vector.multi_reduction <add>, %64, %cst_32 [0] : vector<8x128xf32> to vector<128xf32>
    %66 = vector.shape_cast %65 : vector<128xf32> to vector<1x128xf32>
    %cst_33 = arith.constant 8.000000e+00 : f32
    %67 = vector.broadcast %cst_33 : f32 to vector<1x128xf32>
    %68 = arith.divf %66, %67 : vector<1x128xf32>
    %69 = vector.broadcast %61 : vector<1x128xf32> to vector<8x128xf32>
    %70 = arith.subf %57, %69 : vector<8x128xf32>
    %cst_34 = arith.constant 9.99999974E-6 : f32
    %71 = vector.broadcast %cst_34 : f32 to vector<1x128xf32>
    %72 = arith.addf %68, %71 : vector<1x128xf32>
    %73 = math.rsqrt %72 : vector<1x128xf32>
    %74 = vector.broadcast %73 : vector<1x128xf32> to vector<8x128xf32>
    %75 = arith.mulf %70, %74 : vector<8x128xf32>
    %76 = vector.broadcast %12 : vector<8x1xf32> to vector<8x128xf32>
    %77 = arith.mulf %75, %76 : vector<8x128xf32>
    %78 = vector.broadcast %13 : vector<8x1xf32> to vector<8x128xf32>
    %79 = arith.addf %77, %78 : vector<8x128xf32>
    %cst_35 = arith.constant dense<0.000000e+00> : vector<1x128xf32>
    %80 = tpu.matmul %5, %79, %cst_35 {dimension_numbers = #tpu.dot_dimension_numbers<[1], [0], [0], [1], [0, 0, 1, 1], [], []>} : vector<1x8xf32>, vector<8x128xf32>, vector<1x128xf32> -> vector<1x128xf32>
    %81 = vector.broadcast %14 : vector<1x1xf32> to vector<1x128xf32>
    %82 = arith.addf %80, %81 : vector<1x128xf32>
    %c0_36 = arith.constant 0 : index
    %c0_37 = arith.constant 0 : index
    %83 = vector.load %arg5[%c0_36, %c0_37] : memref<1x128xf32, #tpu.memory_space<vmem>>, vector<1x128xf32>
    tpu.vector_store %arg5[%c0_36, %c0_37], %82 {strides = array<i32>} : memref<1x128xf32, #tpu.memory_space<vmem>>, vector<1x128xf32>,
    return
  }
  func.func @transform_0(%arg0: i32) -> i32 {
    %c0_i32 = arith.constant 0 : i32
    %c0_i32_0 = arith.constant 0 : i32
    return %c0_i32 : i32
  }
  func.func @transform_1(%arg0: i32) -> (i32, i32) {
    %c0_i32 = arith.constant 0 : i32
    %c0_i32_0 = arith.constant 0 : i32
    return %c0_i32, %arg0 : i32, i32
  }
  func.func @transform_2(%arg0: i32) -> (i32, i32) {
    %c0_i32 = arith.constant 0 : i32
    %c0_i32_0 = arith.constant 0 : i32
    %c0_i32_1 = arith.constant 0 : i32
    return %c0_i32, %c0_i32_0 : i32, i32
  }
  func.func @transform_3(%arg0: i32) -> (i32, i32) {
    %c0_i32 = arith.constant 0 : i32
    %c0_i32_0 = arith.constant 0 : i32
    %c0_i32_1 = arith.constant 0 : i32
    return %c0_i32, %c0_i32_0 : i32, i32
  }
  func.func @transform_4(%arg0: i32) -> (i32, i32) {
    %c0_i32 = arith.constant 0 : i32
    %c0_i32_0 = arith.constant 0 : i32
    return %c0_i32, %arg0 : i32, i32
  }
  func.func @transform_5(%arg0: i32) -> (i32, i32) {
    %c0_i32 = arith.constant 0 : i32
    %c0_i32_0 = arith.constant 0 : i32
    return %c0_i32, %arg0 : i32, i32
  }
}

</mosaic_0001>

<bundles_post_ra>
// kernel: tpu_custom_call.1
= control target key start
LH: loop header
LB: loop body
LE: loop exit
PB: predicated region body
PF: predicated region fallthrough
CT: control target
= control target key end

     0   :  { %12 = vsyncpa [#allocation5], 0  ;;  %s1482_s0 = inlined_call_operand.<no memory space> [shape: s32[1], index: 0, kind: input, shape index: {}]   ;;  %s1483_s1 = inlined_call_operand.vmem [shape: f32[16,256], index: 1, kind: input, shape index: {}]   ;;  %s1484_s2 = inlined_call_operand.vmem [shape: f32[80,32], index: 2, kind: input, shape index: {}]   ;;  %s1485_s3 = inlined_call_operand.vmem [shape: f32[32,16], index: 3, kind: input, shape index: {}]   ;;  %s1486_s4 = inlined_call_operand.hbm [shape: f32[1,256], index: 4, kind: output, shape index: {0}]   ;;  %s1487_s5 = inlined_call_operand.hbm [shape: f32[16,256], index: 5, kind: output, shape index: {1}]  }
   0x1   :  { %14 = vsyncpa [#allocation5 + $0x1], 0 }
   0x2   :  { %15 = vsyncpa [#allocation7], 0 }
   0x3   :  { %17 = vsyncpa [#allocation7 + $0x1], 0  ;;  %s1249_s0 = smov 0   ;;  %s1251_s18 = smov 0  }
   0x4   :  { %s1253_s19 = smov 0   ;;  %s1255_s20 = smov 0  }
   0x5 LB: > { %s1270_s21 = sadd.s32 4294967295, %s1200_s20   ;;  %s937_s22 = sadd.s32 4294967294, %s1200_s20   ;;  %s1200_s20 = sphi %s1255_s20, %s1493_s20   ;;  %s1196_s19 = sphi %s1253_s19, %s1492_s19   ;;  %s1192_s18 = sphi %s1251_s18, %s1491_s18   ;;  %s1188_s0 = sphi %s1249_s0, %s1490_s0  }
   0x6   : > { %s1274_s23 = sadd.s32 1, %s1200_s20   ;;  %s51_s24 = sadd.s32 1, %s1196_s19 }
   0x7   : > { %s48_s25 = ssub.s32 %s1200_s20, %s1274_s23  ;;  %p58_p0 = scmp.ne.s32.totalorder %s1196_s19, %s1192_s18 }
   0x8   : > { %p49_p1 = scmp.eq.s32.totalorder %s48_s25, 0  ;;  %p59_p2 = scmp.eq.s32.totalorder %s1200_s20, 0 }
   0x9   : > { %p130_p3 = scmp.eq.s32.totalorder %s1270_s21, 1  ;;  %p135_p4 = scmp.ne.s32.totalorder %s1192_s18, %s1188_s0 }
   0xa   : > { %s1286_s26 = scalar_select %p49_p1, %s1196_s19, %s51_s24  }
   0xb   : > { %p60_p5 = por %p59_p2, %p58_p0  ;;  %p1288_p6 = por %p130_p3, %p58_p0 }
   0xc   : > { %p136_p7 = scmp.eq.s32.totalorder %s937_s22, 1  ;;  %p939_p9 = scmp.ge.s32.totalorder %s1200_s20, 2 }
   0xe   : > { %p1292_p8 = por %p136_p7, %p135_p4  ;;  %187 = sbr.rel (%p939_p9) target bundleno = 28 (0x1c), region = 28 }
  0x15   : > { %190 = sbr.rel (!%p60_p5) target bundleno = 28 (0x1c), region = 32  ;;  %s192_s29 = sand.u32 (%p60_p5), 1, %s1196_s19  }
  0x16   : > { %s941_s30 = sshll.u32 (%p60_p5), %s1200_s20, 3  ;;  %s940_s6 = sshll.u32 (%p60_p5), %s192_s29, 4 }
  0x17   : > { %s196_s9 = scalar_lea.vmem (%p60_p5), %s1483_s1, %s941_s30  ;;  %s194_s10 = scalar_lea.vmem (%p60_p5), [#allocation3], %s940_s6 }
  0x18   : > { %v226_v0 = vld [vmem:[%s196_s9] sm:$0xff] (%p60_p5)  ;;  %v228_v1 = vld [vmem:[%s196_s9 + $0x10] sm:$0xff] (%p60_p5) }
  0x19   : > { %227 = vst [vmem:[%s194_s10] sm:$0xff] (%p60_p5), %v226_v0  ;;  %229 = vst [vmem:[%s194_s10 + $0x8] sm:$0xff] (%p60_p5), %v228_v1 }
  0x1c PF: > { %p942_p10 = scmp.ge.s32.totalorder %s1200_s20, 1  ;;  %p234_p11 = scmp.lt.s32.totalorder %s1200_s20, 3 }
  0x1e   : > { %p235_p12 = pnand %p942_p10, %p234_p11 }
  0x1f   : > { %s1307_s11 = sand.u32 (!%p235_p12), 1, %s1192_s18   ;;  %v1202_v2 = vmov (!%p235_p12), 0.0|0.0   ;;  %vm1203_vm0 = vmmov (!%p235_p12), 0   ;;  %v1204_v3 = vmov (!%p235_p12), 0.0   ;;  %v284_v4 = vld [vmem:[%s1485_s3] sm:$0xff] (!%p235_p12)  ;;  %v1205_v5 = vmov (!%p235_p12), 0  }
  0x20   : > { %238 = sbr.rel (%p235_p12) target bundleno = 1256 (0x4e8), region = 70  ;;  %1021 = vmatprep.subr.bf16.mxu0 (!%p235_p12), %v1202_v2  ;;  %s943_s12 = sshll.u32 (!%p235_p12), %s1307_s11, 4  ;;  %983 = vmatprep.mubr.msk.f32.mxu0 (!%p235_p12), %vm1203_vm0, %v1204_v3  ;;  %v274_v9 = vld [vmem:[%s1484_s2] sm:$0xff] (!%p235_p12)  ;;  %vm294_vm1 = vcmask (!%p235_p12), 130048   ;;  %v286_v10 = vld [vmem:[%s1485_s3 + $0x10] sm:$0xff] (!%p235_p12)  ;;  %v1206_v11 = vmov (!%p235_p12), 2  }
  0x21   : > { %1089 = vset.pattern.permute.xlu0 (!%p235_p12), %v1205_v5  ;;  %986 = vmatprep.subr.mxu1 (!%p235_p12), %v1204_v3  ;;  %s243_s15 = scalar_lea.vmem (!%p235_p12), [#allocation3], %s943_s12  ;;  %v1207_v12 = vmov (!%p235_p12), 1   ;;  %v285_v13 = vld [vmem:[%s1485_s3 + $0x8] sm:$0xff] (!%p235_p12)  ;;  %v1208_v14 = vmov (!%p235_p12), 3   ;;  %v1209_v15 = vmov (!%p235_p12), 4   ;;  %v1210_v16 = vmov (!%p235_p12), 5  }
  0x22   : > { %v272_v6 = vld [vmem:[%s243_s15] sm:$0xff] (!%p235_p12)  ;;  %v273_v7 = vld [vmem:[%s243_s15 + $0x8] sm:$0xff] (!%p235_p12)  ;;  %291 = vperm.xlu0 (!%p235_p12), %1089, %v284_v4   ;;  %988 = vmatprep.mubr.msk.f32.mxu1 (!%p235_p12), %vm1203_vm0, %v1204_v3  ;;  %v1211_v18 = vmov (!%p235_p12), 6   ;;  %v1212_v19 = vmov (!%p235_p12), 7   ;;  %vm383_vm2 = vcmask (!%p235_p12), 64512   ;;  %s1366_s17 = scalar_lea.vmem (!%p235_p12), [#allocation6], %s943_s12 }
  0x23   : > { %v1022_v8 = vpack.c.bf16 (!%p235_p12), %v273_v7, %v272_v6  ;;  %1091 = vset.pattern.permute.xlu1 (!%p235_p12), %v1206_v11  ;;  %v287_v17 = vld [vmem:[%s1485_s3 + $0x18] sm:$0xff] (!%p235_p12)  ;;  %v275_v25 = vld [vmem:[%s1484_s2 + $0x8] sm:$0xff] (!%p235_p12)  ;;  %v276_v26 = vld [vmem:[%s1484_s2 + $0x10] sm:$0xff] (!%p235_p12)  ;;  %vm628_vm3 = vcmask (!%p235_p12), 261120   ;;  %s841_s14 = sshll.u32 (!%p235_p12), %s1366_s17, 4  ;;  %s957_s15 = sshll.u32 (!%p235_p12), %s1270_s21, 7  ;;  %s1401_s14 = int_to_ptr.vmem [resolvable:$true] %s841_s14 }
  0x24   : > { %497 = vperm.xlu1 (!%p235_p12), %1091, %v284_v4   ;;  %v277_v27 = vld [vmem:[%s1484_s2 + $0x18] sm:$0xff] (!%p235_p12)  ;;  %v278_v28 = vld [vmem:[%s1484_s2 + $0x20] sm:$0xff] (!%p235_p12)  ;;  %v280_v11 = vld [vmem:[%s1484_s2 + $0x30] sm:$0xff] (!%p235_p12)  ;;  %s1407_s22 = scalar_lea.hbm (!%p235_p12), %s1487_s5, %s957_s15  ;;  %s816_s24 = scalar_lea.sflag (!%p235_p12), [#allocation7], %s1307_s11 }
  0x25   : > { %1023 = vmatpush3.bf16.msra.mxu0 (!%p235_p12), %v1022_v8  ;;  %s1106_s25 = scalar_lea.vmem (!%p235_p12), %s1401_s14, 256  ;;  %s1214_s29 = smov (!%p235_p12), [#allocation6]  }
  0x26   : > { %1090 = vset.pattern.permute.xlu0 (!%p235_p12), %v1207_v12  ;;  %p1107_p13 = scmp.ne.s32.totalorder (!%p235_p12), %s1401_s14, %s1106_s25  ;;  %s1110_s30 = sshll.u32 (!%p235_p12), %s1214_s29, 4  ;;  %s1111_s30 = int_to_ptr.vmem [resolvable:$false] %s1110_s30 }
  0x27   : > { %380 = vperm.xlu0 %1090, %v286_v10   ;;  %p1113_p2 = scmp.lt.s32.totalorder %s1401_s14, %s1111_s30 }
  0x28   : > { %984 = vmatmul.mubr.msk.f32.vlgmr.msra.gmra.mrb[0].mxu0 %vm294_vm1, %v274_v9  ;;  %1092 = vset.pattern.permute.xlu1 %v1208_v14  ;;  %p1108_p0 = pnand %p1107_p13, %p1288_p6 }
  0x29   : > { %502 = vperm.xlu1 %1092, %v284_v4   ;;  %999 = vmatprep.mubr.msk.f32.mxu0 %vm383_vm2, %v278_v28  ;;  %v1213_v28 = vmov 8  }
  0x2a   : > { %p1109_p1 = pneg %p1108_p0 }
  0x2b   : > { %1094 = vset.pattern.permute.xlu0 %v1209_v15 }
  0x2c   : > { %511 = vperm.xlu0 %1094, %v285_v13  }
  0x2d   : > { %1093 = vset.pattern.permute.xlu1 %v1209_v15 }
  0x2e   : > { %507 = vperm.xlu1 %1093, %v284_v4  }
  0x30   : > { %1095 = vset.pattern.permute.xlu0 %v1210_v16 }
  0x31   : > { %625 = vperm.xlu0 %1095, %v284_v4  }
  0x32   : > { %515 = vperm.xlu1 %1093, %v286_v10   ;;  %v279_v10 = vld [vmem:[%s1484_s2 + $0x28] sm:$0xff] }
  0x35   : > { %1098 = vset.pattern.permute.xlu0 %v1207_v12 }
  0x36   : > { %370 = vperm.xlu0 %1098, %v284_v4   ;;  %520 = vperm.xlu1 %1093, %v287_v17  }
  0x3a   : > { %1096 = vset.pattern.permute.xlu1 %v1211_v18  ;;  %1101 = vset.pattern.permute.xlu0 %v1213_v28 }
  0x3b   : > { %723 = vperm.xlu1 %1096, %v284_v4  }
  0x3f   : > { %1097 = vset.pattern.permute.xlu1 %v1212_v19 }
  0x40   : > { %728 = vperm.xlu1 %1097, %v284_v4  }
  0x44   : > { %1099 = vset.pattern.permute.xlu1 %v1207_v12  ;;  %v281_v12 = vld [vmem:[%s1484_s2 + $0x38] sm:$0xff] }
  0x45   : > { %375 = vperm.xlu1 %1099, %v285_v13  }
  0x49   : > { %1100 = vset.pattern.permute.xlu1 %v1213_v28 }
  0xa1   : > { %v292_v20 = vpop.permute.xlu0 %291 }
  0xa3   : > { %v498_v29 = vpop.permute.xlu1 %497 }
  0xa6   : > { %v381_v33 = vpop.permute.xlu0 %380 }
  0xa8   : > { %v503_v30 = vpop.permute.xlu1 %502 }
  0xab   : > { %v512_v35 = vpop.permute.xlu0 %511 }
  0xad   : > { %v508_v31 = vpop.permute.xlu1 %507 }
  0xb0   : > { %v1360_v37 = vpop.permute.xlu0 %625 }
  0xb1   : > { %v1356_v32 = vpop.permute.xlu1 %515 }
  0xb5   : > { %v521_v34 = vpop.permute.xlu1 %520  ;;  %v371_v39 = vpop.permute.xlu0 %370 }
  0xba   : > { %v1358_v36 = vpop.permute.xlu1 %723 }
  0xbf   : > { %v1362_v38 = vpop.permute.xlu1 %728 }
  0xc4   : > { %v376_v43 = vpop.permute.xlu1 %375 }
  0xfb   : > { %v364_v21 = vpop.f32.mrb[0].mxu0 }
  0xfc   : > { %v365_v22 = vadd.f32 %v364_v21, %v292_v20  ;;  %v985_v23 = vpop.f32.mrb[1].mxu0 }
  0xfe   : > { %v368_v24 = vmax.f32 %v365_v22, 0.0 }
 0x100   : > { %987 = vmatpush3.msra.mxu1 %v368_v24 }
 0x101   : > { %989 = vmatmul.mubr.msk.f32.vlgmr.msra.gmra.mrb[0].mxu1 %vm383_vm2, %v275_v25  ;;  %1024 = vmatprep.subr.bf16.mxu1 %v1202_v2 }
 0x102   : > { %991 = vmatprep.mubr.msk.f32.mxu1 %vm1203_vm0, %v1204_v3 }
 0x105   : > { %992 = vmatmul.mubr.msk.f32.gmra.mrb[2].mxu1 %vm383_vm2, %v276_v26 }
 0x106   : > { %994 = vmatprep.mubr.msk.f32.mxu1 %vm1203_vm0, %v1204_v3 }
 0x109   : > { %995 = vmatmul.mubr.msk.f32.gmra.mrb[4].mxu1 %vm383_vm2, %v277_v27  ;;  %v288_v27 = vld [vmem:[%s1485_s3] sm:$0x1] }
 0x10a   : > { %1013 = vmatprep.mubr.msk.f32.mxu1 %vm1203_vm0, %v1204_v3  ;;  %734 = vperm.xlu1 %1100, %v288_v27  }
 0x1d4   : > { %v459_v40 = vpop.f32.mrb[0].mxu1 }
 0x1d5   : > { %v460_v41 = vadd.f32 %v459_v40, %v371_v39  ;;  %v990_v42 = vpop.f32.mrb[1].mxu1 }
 0x1d7   : > { %473 = vst [vmem:[%s1366_s17] sm:$0xff] %v460_v41 }
 0x1d8   : > { %v464_v44 = vpop.f32.mrb[2].mxu1 }
 0x1d9   : > { %v465_v45 = vadd.f32 %v464_v44, %v376_v43  ;;  %v993_v46 = vpop.f32.mrb[3].mxu1 }
 0x1db   : > { %474 = vst [vmem:[%s1366_s17 + $0x8] sm:$0xff] %v465_v45  ;;  %s1112_s17 = scalar_lea.vmem %s1111_s30, 512 }
 0x1dc   : > { %v469_v47 = vpop.f32.mrb[4].mxu1  ;;  %p1114_p3 = scmp.lt.s32.totalorder %s1112_s17, %s1106_s25 }
 0x1dd   : > { %v470_v48 = vadd.f32 %v469_v47, %v381_v33  ;;  %v996_v49 = vpop.f32.mrb[5].mxu1 }
 0x1de   : > { %p1115_p4 = por %p1114_p3, %p1113_p2 }
 0x1df   : > { %v475_v50 = vadd.f32 %v470_v48, %v368_v24 }
 0x1e0   : > { %p1116_p5 = pnand %p1115_p4, %p1109_p1 }
 0x1e1   : > { %v476_v51 = vrot.slane %v475_v50, 4 }
 0x1e3   : > { %v477_v52 = vadd.f32 %v476_v51, %v475_v50 }
 0x1e5   : > { %v478_v53 = vrot.slane %v477_v52, 2 }
 0x1e7   : > { %v479_v54 = vadd.f32 %v478_v53, %v477_v52 }
 0x1e9   : > { %v480_v55 = vrot.slane %v479_v54, 1 }
 0x1eb   : > { %v481_v56 = vadd.f32 %v480_v55, %v479_v54  ;;  %v283_v55 = vld [vmem:[%s1484_s2 + $0x48] sm:$0x1] }
 0x1ed   : > { %v483_v57 = vmul.f32 0.125, %v481_v56 }
 0x1ef   : > { %v484_v58 = vsub.f32 %v475_v50, %v483_v57 }
 0x1f1   : > { %v485_v59 = vmul.f32 %v484_v58, %v484_v58 }
 0x1f3   : > { %v486_v60 = vrot.slane %v485_v59, 4 }
 0x1f5   : > { %v487_v61 = vadd.f32 %v486_v60, %v485_v59 }
 0x1f7   : > { %v488_v62 = vrot.slane %v487_v61, 2 }
 0x1f9   : > { %v489_v63 = vadd.f32 %v488_v62, %v487_v61 }
 0x1fb   : > { %v490_v0 = vrot.slane %v489_v63, 1 }
 0x1fd   : > { %v491_v1 = vadd.f32 %v490_v0, %v489_v63 }
 0x1ff   : > { %v492_v4 = vmul.f32 0.125, %v491_v1 }
 0x201   : > { %v493_v5 = vadd.f32 1e-05, %v492_v4 }
 0x203   : > { %1102 = vrsqrt.f32 %v493_v5 }
 0x20d   : > { %v1103_v6 = vpop.eup %1102 }
 0x20e   : > { %v495_v7 = vmul.f32 %v1103_v6, %v484_v58 }
 0x210   : > { %v500_v8 = vmul.f32 %v498_v29, %v495_v7 }
 0x212   : > { %v505_v9 = vadd.f32 %v503_v30, %v500_v8 }
 0x214   : > { %997 = vmatprep.subr.mxu0 %v505_v9 }
 0x215   : > { %998 = vmatpush3.msra.mxu0 %v505_v9 }
 0x216   : > { %1000 = vmatmul.mubr.msk.f32.vlgmr.msra.gmra.mrb[2].mxu0 %vm383_vm2, %v279_v10  ;;  %1016 = vmatprep.subr.mxu0 %v1204_v3 }
 0x217   : > { %1002 = vmatprep.mubr.msk.f32.mxu0 %vm383_vm2, %v280_v11 }
 0x21a   : > { %1003 = vmatmul.mubr.msk.f32.gmra.mrb[4].mxu0 %vm383_vm2, %v281_v12 }
 0x21b   : > { %1018 = vmatprep.mubr.msk.f32.mxu0 %vm1203_vm0, %v1204_v3  ;;  %v282_v3 = vld [vmem:[%s1484_s2 + $0x40] sm:$0xff] }
 0x2e9   : > { %v1001_v13 = vpop.f32.mrb[2].mxu0 }
 0x2ea   : > { %v607_v14 = vadd.f32 %v1001_v13, %v512_v35  ;;  %v601_v15 = vpop.f32.mrb[3].mxu0 }
 0x2eb   : > { %v602_v16 = vadd.f32 %v601_v15, %v508_v31 }
 0x2ec   : > { %v621_v17 = vmax.f32 %v607_v14, 0.0 }
 0x2ed   : > { %v620_v18 = vmax.f32 %v602_v16, 0.0  ;;  %v1004_v19 = vpop.f32.mrb[4].mxu0 }
 0x2ee   : > { %v617_v20 = vadd.f32 %v1004_v19, %v521_v34  ;;  %v611_v21 = vpop.f32.mrb[5].mxu0 }
 0x2ef   : > { %v1025_v22 = vpack.c.bf16 %v621_v17, %v620_v18  ;;  %v612_v23 = vadd.f32 %v611_v21, %v1356_v32 }
 0x2f0   : > { %v623_v24 = vmax.f32 %v617_v20, 0.0 }
 0x2f1   : > { %v622_v25 = vmax.f32 %v612_v23, 0.0  ;;  %1026 = vmatpush3.bf16.msra.mxu1 %v1025_v22 }
 0x2f2   : > { %1027 = vmatprep.subr.bf16.mxu1 %v1202_v2 }
 0x2f3   : > { %v1028_v26 = vpack.c.bf16 %v623_v24, %v622_v25 }
 0x2f5   : > { %1029 = vmatpush3.bf16.msra.mxu1 %v1028_v26 }
 0x2f8   : > { %1014 = vmatmul.mubr.msk.f32.vlgmr.msra.gmra.mrb[6].mxu1 %vm628_vm3, %v282_v3 }
 0x3cb   : > { %v698_v29 = vpop.f32.mrb[6].mxu1 }
 0x3cc   : > { %v699_v30 = vadd.f32 %v698_v29, %v1360_v37  ;;  %v1015_v2 = vpop.f32.mrb[7].mxu1 }
 0x3ce   : > { %v702_v31 = vadd.f32 %v699_v30, %v505_v9 }
 0x3d0   : > { %v703_v32 = vrot.slane %v702_v31, 4 }
 0x3d2   : > { %v704_v33 = vadd.f32 %v703_v32, %v702_v31 }
 0x3d4   : > { %v705_v34 = vrot.slane %v704_v33, 2 }
 0x3d6   : > { %v706_v35 = vadd.f32 %v705_v34, %v704_v33 }
 0x3d8   : > { %v707_v39 = vrot.slane %v706_v35, 1 }
 0x3da   : > { %v708_v40 = vadd.f32 %v707_v39, %v706_v35 }
 0x3dc   : > { %v709_v41 = vmul.f32 0.125, %v708_v40 }
 0x3de   : > { %v710_v42 = vsub.f32 %v702_v31, %v709_v41 }
 0x3e0   : > { %v711_v43 = vmul.f32 %v710_v42, %v710_v42 }
 0x3e2   : > { %v712_v44 = vrot.slane %v711_v43, 4 }
 0x3e4   : > { %v713_v45 = vadd.f32 %v712_v44, %v711_v43 }
 0x3e6   : > { %v714_v46 = vrot.slane %v713_v45, 2 }
 0x3e8   : > { %v715_v47 = vadd.f32 %v714_v46, %v713_v45 }
 0x3ea   : > { %v716_v48 = vrot.slane %v715_v47, 1 }
 0x3ec   : > { %v717_v37 = vadd.f32 %v716_v48, %v715_v47 }
 0x3ee   : > { %v718_v49 = vmul.f32 0.125, %v717_v37 }
 0x3f0   : > { %v719_v50 = vadd.f32 1e-05, %v718_v49 }
 0x3f2   : > { %1104 = vrsqrt.f32 %v719_v50 }
 0x3fc   : > { %v1105_v51 = vpop.eup %1104 }
 0x3fd   : > { %v721_v52 = vmul.f32 %v1105_v51, %v710_v42 }
 0x3ff   : > { %v726_v53 = vmul.f32 %v1358_v36, %v721_v52 }
 0x401   : > { %v731_v54 = vadd.f32 %v1362_v38, %v726_v53 }
 0x403   : > { %1017 = vmatpush3.msra.mxu0 %v731_v54 }
 0x404   : > { %1019 = vmatmul.mubr.msk.f32.vlgmr.msra.gmra.mrb[6].mxu0 %vm383_vm2, %v283_v55 }
 0x405   : > { %1119 = shalt.err (!%p1116_p5)
}
 0x406   : > { %s1120_s6 = scalar_lea.hbm %s1407_s22, 256  ;;  %s1124_s9 = scalar_lea.hbm %s1487_s5, 512 }
 0x407   : > { %p1121_p7 = scmp.ne.s32.totalorder %s1407_s22, %s1120_s6  ;;  %p1125_p12 = scmp.lt.u32.totalorder %s1407_s22, %s1487_s5 }
 0x408   : > { %p1126_p13 = scmp.lt.u32.totalorder %s1124_s9, %s1120_s6  ;;  %p1128_p1 = scmp.lt.u32.totalorder %s1120_s6, %s1407_s22 }
 0x409   : > { %p1122_p10 = pnand %p1121_p7, %p1288_p6 }
 0x40a   : > { %p1127_p0 = por %p1126_p13, %p1125_p12 }
 0x40b   : > { %p1123_p11 = pneg %p1122_p10 }
 0x40c   : > { %p1129_p2 = por %p1128_p1, %p1127_p0 }
 0x40e   : > { %p1130_p3 = pnand %p1129_p2, %p1123_p11 }
 0x410   : > { %1133 = shalt.err (!%p1130_p3)
}
 0x411   : > { %s1215_s15 = smov 128   ;;  %s1216_s16 = smov 256   ;;  %v735_v36 = vpop.permute.xlu1 %734 }
 0x412   : > { %s1217_s12 = smov 8   ;;  %s956_s25 = sshll.u32 %s1270_s21, 4 }
 0x413   : > { %1031 = dma.vmem_to_hbm [thread:$0]  (%p1288_p6), %s1401_s14, 256, %s1407_s22, %s816_s24, %s1215_s15, %s1216_s16, %s1217_s12  }
 0x414   : > { %s264_s29 = scalar_lea.vmem [#allocation4], %s1307_s11  ;;  %s1438_s7 = scalar_lea.hbm %s1486_s4, %s956_s25 }
 0x415   : > { %s829_s30 = sshll.u32 %s264_s29, 4  ;;  %s812_s8 = scalar_lea.sflag [#allocation5], %s1307_s11  ;;  %s1440_s30 = int_to_ptr.vmem [resolvable:$true] %s829_s30 }
 0x416   : > { %s1134_s14 = scalar_lea.vmem %s1440_s30, 16  ;;  %s1218_s21 = smov [#allocation4]  }
 0x417   : > { %p1135_p4 = scmp.ne.s32.totalorder %s1440_s30, %s1134_s14  ;;  %s1138_s22 = sshll.u32 %s1218_s21, 4  ;;  %s1139_s22 = int_to_ptr.vmem [resolvable:$false] %s1138_s22 }
 0x418   : > { %s1140_s24 = scalar_lea.vmem %s1139_s22, 32  ;;  %p1141_p10 = scmp.lt.s32.totalorder %s1440_s30, %s1139_s22 }
 0x419   : > { %p1136_p5 = pnand %p1135_p4, %p1288_p6  ;;  %p1142_p11 = scmp.lt.s32.totalorder %s1140_s24, %s1134_s14 }
 0x41b   : > { %p1137_p7 = pneg %p1136_p5  ;;  %p1143_p12 = por %p1142_p11, %p1141_p10 }
 0x41d   : > { %p1144_p13 = pnand %p1143_p12, %p1137_p7 }
 0x4d7   : > { %v806_v38 = vpop.f32.mrb[6].mxu0 }
 0x4d8   : > { %v807_v56 = vadd.f32 %v806_v38, %v735_v36  ;;  %v1020_v57 = vpop.f32.mrb[7].mxu0 }
 0x4da   : > { %810 = vst [vmem:[%s264_s29] sm:$0x1] %v807_v56 }
 0x4db   : > { %1147 = shalt.err (!%p1144_p13)
}
 0x4dc   : > { %s1148_s11 = scalar_lea.hbm %s1438_s7, 16  ;;  %s1152_s13 = scalar_lea.hbm %s1486_s4, 32 }
 0x4dd   : > { %p1149_p0 = scmp.ne.s32.totalorder %s1438_s7, %s1148_s11  ;;  %p1153_p3 = scmp.lt.u32.totalorder %s1438_s7, %s1486_s4 }
 0x4de   : > { %p1154_p4 = scmp.lt.u32.totalorder %s1152_s13, %s1148_s11  ;;  %p1156_p7 = scmp.lt.u32.totalorder %s1148_s11, %s1438_s7 }
 0x4df   : > { %p1150_p1 = pnand %p1149_p0, %p1288_p6 }
 0x4e0   : > { %p1155_p5 = por %p1154_p4, %p1153_p3 }
 0x4e1   : > { %p1151_p2 = pneg %p1150_p1 }
 0x4e2   : > { %p1157_p10 = por %p1156_p7, %p1155_p5 }
 0x4e4   : > { %p1158_p11 = pnand %p1157_p10, %p1151_p2 }
 0x4e6   : > { %1161 = shalt.err (!%p1158_p11)
}
 0x4e7   : > { %1030 = dma.vmem_to_hbm [thread:$0]  (%p1288_p6), %s1440_s30, 16, %s1438_s7, %s812_s8  }
 0x4e8 PF: > { %s856_s12 = sand.u32 1, %s1188_s0   ;;  %p1035_p12 = pnand %p939_p9, %p1292_p8 }
 0x4e9   : > { %s857_s25 = scalar_lea.sflag [#allocation5], %s856_s12 }
 0x4ea   : > { %1179 = dma.done.wait (!%p1035_p12), %s857_s25, 16  }
 0x4eb   : > { %1181 = vsyncadd (!%p1035_p12), %s857_s25, 4294967280  ;;  %s865_s29 = scalar_lea.sflag [#allocation7], %s856_s12 }
 0x4ec   : > { %1183 = dma.done.wait (!%p1035_p12), %s865_s29, 256  }
 0x4ed   : > { %1185 = vsyncadd (!%p1035_p12), %s865_s29, 4294967040  ;;  %p20_p6 = scmp.ge.s32.totalorder %s1274_s23, 4   ;;  %s1490_s0 = smov %s1192_s18 }
 0x4ee   : > { %s1491_s18 = smov %s1196_s19  ;;  %s1492_s19 = smov %s1286_s26 }
 0x4ef   : > { %s1493_s20 = smov %s1274_s23  ;;  %22 = sbr.rel (!%p20_p6) target bundleno = 5 (0x5), region = 131 }
 0x4f6   :  { %870 = vsyncpa [#allocation5], 1 }
 0x4f7   :  { %872 = vsyncpa [#allocation5 + $0x1], 1 }
 0x4f8   :  { %873 = vsyncpa [#allocation7], 1 }
 0x4f9   :  { %875 = vsyncpa [#allocation7 + $0x1], 1 }

</bundles_post_ra>
